<compile_context>
chip_gen: v7x
topology: tpu7x:2x2x1
jax: 0.10.0
libtpu: 0.0.40
codegen_flags: <defaults>
</compile_context>

<pallas_src>
import numpy as np
import jax
import jax.numpy as jnp
from jax.experimental import pallas as pl
from jax.experimental.pallas import tpu as pltpu

# ----------------------------- model config -----------------------------
VOCAB_SIZE = 50
EMBEDDING_SIZE = 32
CONV_HIDDEN_SIZE = 16
KERNEL_SIZES = [3, 4, 5]
K_MAX = max(KERNEL_SIZES)
OUTPUT_SIZE = 4
PAD_IDX = 0
UNK_IDX = 1
BATCH = 2
MAX_LEN = 16
NEG_INF = -1e30
# pooling_method == F.max_pool1d over the full time axis; eval-mode forward.


def _make_fused_kernel(batch: int, seq_len: int):
    """One kernel: one-hot x folded-conv matmul, tap reduce, mask+bias, pool, FC, sigmoid."""
    B, L = batch, seq_len
    V, H, O = VOCAB_SIZE, CONV_HIDDEN_SIZE, OUTPUT_SIZE
    C3 = len(KERNEL_SIZES) * H          # 48 packed conv output channels
    RS = B * L                          # rows of the fused conv output
    RE = RS + K_MAX - 1                 # rows of the flattened, pad-extended ids

    def kernel(ids_ref, wp_ref, consts_ref, out_ref):
        # ---- one-hot gather fused with (pre-clipped table @ conv taps): single wide dot ----
        ids = ids_ref[...]                                               # (RE, 1) int32
        vocab_iota = jax.lax.broadcasted_iota(jnp.int32, (RE, V), 1)
        onehot = (ids == vocab_iota).astype(jnp.bfloat16)                # (RE, V), exact 0/1
        big = jnp.dot(onehot, wp_ref[...],
                      preferred_element_type=jnp.float32)                # (RE, K_MAX*C3) f32

        # ---- conv over time: reduce the K_MAX tap blocks with static shifted slices ----
        acc = big[0:RS, 0:C3]
        for dk in range(1, K_MAX):
            acc = acc + big[dk:dk + RS, dk * C3:(dk + 1) * C3]           # (RS, C3)

        # ---- precomputed penalty (+bias where valid, -1e30 where not), max-pool, ReLU ----
        masked = acc + consts_ref[0:RS, :]                               # (RS, C3)
        pooled = jnp.max(masked.reshape(B, L, C3), axis=1)               # (B, C3)
        pooled = jnp.maximum(pooled, 0.0)

        # ---- FC (+ bias row) and sigmoid, f32 ----
        fc_w = consts_ref[RS:RS + C3, 0:O]                               # (C3, O)
        fc_b = consts_ref[RS + C3:RS + C3 + 1, 0:O]                      # (1, O)
        logits = jnp.dot(pooled, fc_w, preferred_element_type=jnp.float32) + fc_b
        out_ref[...] = jax.nn.sigmoid(logits).astype(out_ref.dtype)

    return kernel


def init_params(key):
    """PyTorch-layout parameters (Conv1d weights are (H, E, k), Linear is (O, 3H))."""
    k_emb, k_fc_w, k_fc_b, *k_convs = jax.random.split(key, 3 + 2 * len(KERNEL_SIZES))

    emb = jax.random.normal(k_emb, (VOCAB_SIZE, EMBEDDING_SIZE), jnp.float32)
    emb = emb.at[PAD_IDX].set(0.0)
    emb = emb.at[UNK_IDX].set(0.0)

    conv_ws, conv_bs = [], []
    for idx, ks in enumerate(KERNEL_SIZES):
        kw, kb = k_convs[2 * idx], k_convs[2 * idx + 1]
        conv_ws.append(0.1 * jax.random.normal(kw, (CONV_HIDDEN_SIZE, EMBEDDING_SIZE, ks),
                                               jnp.float32))
        conv_bs.append(0.1 * jax.random.normal(kb, (CONV_HIDDEN_SIZE,), jnp.float32))

    fc_w = 0.1 * jax.random.normal(
        k_fc_w, (OUTPUT_SIZE, len(KERNEL_SIZES) * CONV_HIDDEN_SIZE), jnp.float32)
    fc_b = 0.1 * jax.random.normal(k_fc_b, (OUTPUT_SIZE,), jnp.float32)

    return {"embedding": emb, "conv_ws": conv_ws, "conv_bs": conv_bs,
            "fc_w": fc_w, "fc_b": fc_b}


def pack_params(params, batch: int, seq_len: int):
    """Offline packing: clip table, fold it into conv taps, bake mask+bias, pack FC."""
    B, L = batch, seq_len
    E, H, O, V = EMBEDDING_SIZE, CONV_HIDDEN_SIZE, OUTPUT_SIZE, VOCAB_SIZE
    C3 = len(KERNEL_SIZES) * H
    RS = B * L

    # max_norm=1.0 row clip (PyTorch renorm of looked-up rows — here applied to whole table,
    # which yields the same forward output since unused rows never contribute).
    table = np.asarray(params["embedding"], np.float32)
    norms = np.sqrt(np.sum(table * table, axis=1, keepdims=True))
    table = table / np.maximum(norms, 1.0)

    # Per-tap conv weights (E, C3); taps >= kernel_size stay zero. Fold the table in:
    # wp_v[:, dk*C3:(dk+1)*C3] = table_clipped @ tap_dk  -> (V, K_MAX*C3).
    wp = np.zeros((K_MAX, E, C3), np.float32)
    for i, (w, ks) in enumerate(zip(params["conv_ws"], KERNEL_SIZES)):
        wp[:ks, :, i * H:(i + 1) * H] = np.transpose(np.asarray(w, np.float32), (2, 1, 0))
    wp_v = np.zeros((V, K_MAX * C3), np.float32)
    for dk in range(K_MAX):
        wp_v[:, dk * C3:(dk + 1) * C3] = table @ wp[dk]

    # Additive penalty carrying the conv bias: valid (t <= L-k) -> +bias_c, else -1e30.
    conv_bias = np.concatenate([np.asarray(b, np.float32) for b in params["conv_bs"]])
    ks_per_col = np.repeat(np.asarray(KERNEL_SIZES, np.int32), H)          # (C3,)
    t = np.arange(RS, dtype=np.int32) % L
    valid = t[:, None] <= (L - ks_per_col)[None, :]
    penalty = np.where(valid, conv_bias[None, :], np.float32(NEG_INF)).astype(np.float32)

    # FC weight/bias packed below the penalty rows, padded to C3 lanes.
    fc_block = np.zeros((C3 + 1, C3), np.float32)
    fc_block[0:C3, 0:O] = np.asarray(params["fc_w"], np.float32).T
    fc_block[C3, 0:O] = np.asarray(params["fc_b"], np.float32)

    consts = np.concatenate([penalty, fc_block], axis=0)                   # (RS+C3+1, C3)

    return {"wp_v": jnp.asarray(wp_v, jnp.bfloat16),     # MXU operand in bf16
            "consts": jnp.asarray(consts, jnp.float32)}


def conv_network_forward(text_batch, text_lengths, packed):
    """Mirrors ConvNetwork.forward (eval mode)."""
    del text_lengths  # only used for shape asserts in the PyTorch module
    B, L = text_batch.shape
    assert L >= K_MAX, "sequence length must be >= max kernel size (PyTorch would raise)"
    RS = B * L
    RE = RS + K_MAX - 1

    # Flatten token ids and append K_MAX-1 pad ids (their windows are masked anyway).
    ids = jnp.concatenate(
        [text_batch.reshape(RS),
         jnp.full((K_MAX - 1,), PAD_IDX, text_batch.dtype)]).astype(jnp.int32).reshape(RE, 1)

    vmem = pl.BlockSpec(memory_space=pltpu.MemorySpace.VMEM)
    # Gridless on purpose: at B*L=32 a grid only adds per-step overhead. For production
    # sizes, add a "parallel" grid over multiple-of-8 row blocks of the flattened B*L dim
    # (keep wp_v/consts unblocked) so v7x's two TensorCores split the work.
    return pl.pallas_call(
        _make_fused_kernel(B, L),
        out_shape=jax.ShapeDtypeStruct((B, OUTPUT_SIZE), jnp.float32),
        in_specs=[vmem, vmem, vmem],
        out_specs=vmem,
    )(ids, packed["wp_v"], packed["consts"])


def _reference_forward(text_batch, params):
    """Pure-JAX mirror of the PyTorch module (eval mode) for a sanity check."""
    B, L = text_batch.shape
    H = CONV_HIDDEN_SIZE
    table = params["embedding"]
    norms = jnp.linalg.norm(table, axis=1, keepdims=True)
    table = table / jnp.maximum(norms, 1.0)
    emb = table[text_batch]                                          # (B, L, E)
    pooled = []
    for w, b, ks in zip(params["conv_ws"], params["conv_bs"], KERNEL_SIZES):
        lout = L - ks + 1
        conv = jnp.zeros((B, lout, H), jnp.float32)
        for dk in range(ks):
            conv = conv + jnp.einsum("ble,he->blh", emb[:, dk:dk + lout, :], w[:, :, dk])
        conv = jax.nn.relu(conv + b[None, None, :])
        pooled.append(jnp.max(conv, axis=1))
    cat = jnp.concatenate(pooled, axis=1)
    logits = cat @ params["fc_w"].T + params["fc_b"]
    return jax.nn.sigmoid(logits)


if __name__ == "__main__":
    key = jax.random.PRNGKey(0)
    k_params, k_text = jax.random.split(key)

    params = init_params(k_params)
    packed = pack_params(params, BATCH, MAX_LEN)

    text_batch = jax.random.randint(k_text, (BATCH, MAX_LEN), 0, VOCAB_SIZE, dtype=jnp.int32)
    text_lengths = jnp.array([MAX_LEN, MAX_LEN - 4], dtype=jnp.int32)

    fwd = jax.jit(conv_network_forward)
    prediction = fwd(text_batch, text_lengths, packed)
    jax.block_until_ready(prediction)
    assert prediction.shape == (BATCH, OUTPUT_SIZE)

    # loose tolerance: folded conv weights are bf16 (f32 accumulate)
    reference = _reference_forward(text_batch, params)
    assert float(jnp.max(jnp.abs(prediction - reference))) < 2e-2

    print("KERNEL_OK")
</pallas_src>

<mosaic_0001>
module attributes {stable_mosaic.version = 11 : i64} {
  func.func @kernel(%arg0: memref<36x1xi32, #tpu.memory_space<vmem>>, %arg1: memref<50x240xbf16, #tpu.memory_space<vmem>>, %arg2: memref<81x48xf32, #tpu.memory_space<vmem>>, %arg3: memref<2x4xf32, #tpu.memory_space<vmem>>) attributes {dimension_semantics = [], scalar_prefetch = 0 : i64, scratch_operands = 0 : i64, tpu.core_type = #tpu.core_type<tc>} {
    %c0 = arith.constant 0 : index
    %c0_0 = arith.constant 0 : index
    %0 = vector.load %arg0[%c0, %c0_0] : memref<36x1xi32, #tpu.memory_space<vmem>>, vector<36x1xi32>
    %1 = tpu.iota {dimensions = array<i32: 1>} : vector<36x50xi32>
    %2 = vector.broadcast %0 : vector<36x1xi32> to vector<36x50xi32>
    %3 = arith.cmpi eq, %2, %1 : vector<36x50xi32>
    %4 = arith.extui %3 : vector<36x50xi1> to vector<36x50xi32>
    %5 = arith.sitofp %4 : vector<36x50xi32> to vector<36x50xf32>
    %6 = arith.truncf %5 : vector<36x50xf32> to vector<36x50xbf16>
    %c0_1 = arith.constant 0 : index
    %c0_2 = arith.constant 0 : index
    %7 = vector.load %arg1[%c0_1, %c0_2] : memref<50x240xbf16, #tpu.memory_space<vmem>>, vector<50x240xbf16>
    %cst = arith.constant dense<0.000000e+00> : vector<36x240xf32>
    %8 = tpu.matmul %6, %7, %cst {dimension_numbers = #tpu.dot_dimension_numbers<[1], [0], [0], [1], [0, 0, 1, 1], [], []>} : vector<36x50xbf16>, vector<50x240xbf16>, vector<36x240xf32> -> vector<36x240xf32>
    %9 = vector.extract_strided_slice %8 {offsets = [0, 0], sizes = [32, 48], strides = [1, 1]} : vector<36x240xf32> to vector<32x48xf32>
    %10 = vector.extract_strided_slice %8 {offsets = [1, 48], sizes = [32, 48], strides = [1, 1]} : vector<36x240xf32> to vector<32x48xf32>
    %11 = arith.addf %9, %10 : vector<32x48xf32>
    %12 = vector.extract_strided_slice %8 {offsets = [2, 96], sizes = [32, 48], strides = [1, 1]} : vector<36x240xf32> to vector<32x48xf32>
    %13 = arith.addf %11, %12 : vector<32x48xf32>
    %14 = vector.extract_strided_slice %8 {offsets = [3, 144], sizes = [32, 48], strides = [1, 1]} : vector<36x240xf32> to vector<32x48xf32>
    %15 = arith.addf %13, %14 : vector<32x48xf32>
    %16 = vector.extract_strided_slice %8 {offsets = [4, 192], sizes = [32, 48], strides = [1, 1]} : vector<36x240xf32> to vector<32x48xf32>
    %17 = arith.addf %15, %16 : vector<32x48xf32>
    %c0_3 = arith.constant 0 : index
    %c0_4 = arith.constant 0 : index
    %18 = vector.load %arg2[%c0_3, %c0_4] : memref<81x48xf32, #tpu.memory_space<vmem>>, vector<32x48xf32>
    %19 = arith.addf %17, %18 : vector<32x48xf32>
    %20 = vector.shape_cast %19 : vector<32x48xf32> to vector<2x16x48xf32>
    %cst_5 = arith.constant dense<0xFF800000> : vector<2x48xf32>
    %21 = vector.multi_reduction <maximumf>, %20, %cst_5 [1] : vector<2x16x48xf32> to vector<2x48xf32>
    %cst_6 = arith.constant 0.000000e+00 : f32
    %22 = vector.broadcast %cst_6 : f32 to vector<2x48xf32>
    %23 = arith.maximumf %21, %22 : vector<2x48xf32>
    %c32 = arith.constant 32 : index
    %c0_7 = arith.constant 0 : index
    %24 = vector.load %arg2[%c32, %c0_7] : memref<81x48xf32, #tpu.memory_space<vmem>>, vector<48x4xf32>
    %c80 = arith.constant 80 : index
    %c0_8 = arith.constant 0 : index
    %25 = vector.load %arg2[%c80, %c0_8] : memref<81x48xf32, #tpu.memory_space<vmem>>, vector<1x4xf32>
    %cst_9 = arith.constant dense<0.000000e+00> : vector<2x4xf32>
    %26 = tpu.matmul %23, %24, %cst_9 {dimension_numbers = #tpu.dot_dimension_numbers<[1], [0], [0], [1], [0, 0, 1, 1], [], []>} : vector<2x48xf32>, vector<48x4xf32>, vector<2x4xf32> -> vector<2x4xf32>
    %27 = vector.broadcast %25 : vector<1x4xf32> to vector<2x4xf32>
    %28 = arith.addf %26, %27 : vector<2x4xf32>
    %29 = arith.negf %28 : vector<2x4xf32>
    %30 = math.exp %29 : vector<2x4xf32>
    %cst_10 = arith.constant 1.000000e+00 : f32
    %31 = vector.broadcast %cst_10 : f32 to vector<2x4xf32>
    %32 = arith.addf %31, %30 : vector<2x4xf32>
    %33 = arith.divf %31, %32 : vector<2x4xf32>
    %c0_11 = arith.constant 0 : index
    %c0_12 = arith.constant 0 : index
    %34 = vector.load %arg3[%c0_11, %c0_12] : memref<2x4xf32, #tpu.memory_space<vmem>>, vector<2x4xf32>
    tpu.vector_store %arg3[%c0_11, %c0_12], %33 {strides = array<i32>} : memref<2x4xf32, #tpu.memory_space<vmem>>, vector<2x4xf32>,
    return
  }
}

</mosaic_0001>

<bundles_post_ra>
// kernel: conv_network_forward.1
= control target key start
LH: loop header
LB: loop body
LE: loop exit
PB: predicated region body
PF: predicated region fallthrough
CT: control target
= control target key end

     0   :  { %v559_v2 = vmov 0   ;;  %s733_s0 = inlined_call_operand.vmem [shape: s32[36,1], index: 0, kind: input, shape index: {}]   ;;  %s734_s1 = inlined_call_operand.vmem [shape: bf16[50,240], index: 1, kind: input, shape index: {}]   ;;  %s735_s2 = inlined_call_operand.vmem [shape: f32[81,48], index: 2, kind: input, shape index: {}]   ;;  %s736_s3 = inlined_call_operand.hbm [shape: f32[2,4], index: 3, kind: output, shape index: {}]  }
   0x1   :  { %v18_v0 = vld [vmem:[%s733_s0 + $0x10] sm:$0xff]  ;;  %v16_v1 = vld [vmem:[%s733_s0] sm:$0xff]  ;;  %519 = vset.pattern.permute.xlu1 %v559_v2  ;;  %518 = vset.pattern.permute.xlu0 %v559_v2  ;;  %v19_v3 = vld [vmem:[%s733_s0 + $0x18] sm:$0xff] }
   0x2   :  { %v17_v4 = vld [vmem:[%s733_s0 + $0x8] sm:$0xff]  ;;  %30 = vperm.xlu0 %518, %v18_v0   ;;  %24 = vperm.xlu1 %519, %v16_v1   ;;  %v523_v7 = vld [vmem:[%s734_s1 + $0x14] ss:$8 sps:$4 sm:$0xff]   ;;  %v525_v8 = vld [vmem:[%s734_s1 + $0x10] ss:$8 sps:$4 sm:$0xff]  }
   0x3   :  { %v520_v5 = vld [vmem:[%s734_s1 + $0x4] ss:$8 sps:$4 sm:$0xff]   ;;  %v522_v6 = vld [vmem:[%s734_s1] ss:$8 sps:$4 sm:$0xff]   ;;  %147 = vmatprep.mubr.bf16.mxu0 %v559_v2  ;;  %157 = vmatprep.mubr.bf16.mxu1 %v559_v2 }
   0x4   :  { %115 = vmatprep.subr.bf16.mxu0 %v520_v5  ;;  %501 = vmatprep.subr.bf16.mxu1 %v520_v5  ;;  %v526_v9 = vld [vmem:[%s734_s1 + $0x24] ss:$8 sps:$4 sm:$0xff]  }
   0x5   :  { %116 = vmatpush1.bf16.msra.mxu0 %v522_v6  ;;  %505 = vmatpush1.bf16.msra.mxu1 %v522_v6 }
   0x6   :  { %33 = vperm.xlu0 %518, %v19_v3   ;;  %27 = vperm.xlu1 %519, %v17_v4  }
   0x7   :  { %8 = vsyncpa [#allocation3], 0  ;;  %v20_v10 = vld [vmem:[%s733_s0 + $0x20] sm:$0xf]  ;;  %117 = vmatprep.subr.bf16.mxu0 %v523_v7  ;;  %502 = vmatprep.subr.bf16.mxu1 %v523_v7  ;;  %v62_v11 = vld [vmem:[%s734_s1 + $0x30] sm:$0x11]  ;;  %v21_v16 = vlaneseq }
   0x8   :  { %v528_v12 = vld [vmem:[%s734_s1 + $0x20] ss:$8 sps:$4 sm:$0xff]   ;;  %v462_v13 = vcombine.high %v62_v11, %v62_v11  ;;  %v461_v14 = vcombine.low %v62_v11, %v62_v11  ;;  %vm108_vm0 = vcmask 1040384   ;;  %vm98_vm5 = vcmask 408576   ;;  %s561_s0 = smov 80   ;;  %s562_s1 = smov 32  }
   0x9   :  { %118 = vmatpush1.bf16.msra.mxu0 %v525_v8  ;;  %506 = vmatpush1.bf16.msra.mxu1 %v525_v8  ;;  %v22_v17 = vand.u32 127, %v21_v16  ;;  %v560_v22 = vmov 0.0   ;;  %vm181_vm7 = vcmask 1046528   ;;  %vm212_vm8 = vcmask 1045504   ;;  %s563_s9 = smov 112   ;;  %s564_s10 = smov 64  }
   0xa   :  { %36 = vperm.xlu0 %518, %v20_v10   ;;  %119 = vmatprep.subr.bf16.mxu0 %v526_v9  ;;  %v110_v15 = vsel %vm108_vm0, %v461_v14, 0  ;;  %vm260_vm9 = vcmask 1044480   ;;  %vm286_vm10 = vcmask 1043456   ;;  %vm566_vm11 = vmmov 0   ;;  %s567_s6 = smov [#allocation2]  }
   0xb   :  { %503 = vmatprep.subr.bf16.mxu1 %v526_v9  ;;  %vm247_vm12 = vcmask 261120   ;;  %vm320_vm13 = vcmask 392192   ;;  %vm354_vm14 = vcmask 1041409   ;;  %s442_s7 = sshll.u32 %s567_s6, 4  ;;  %vm434_vm15 = vcmask 25600   ;;  %s443_s7 = int_to_ptr.vmem [resolvable:$true] %s442_s7 }
   0xc   :  { %s535_s8 = scalar_lea.vmem %s443_s7, 32  ;;  %p540_p1 = scmp.lt.s32.totalorder %s443_s7, %s443_s7 }
   0xd   :  { %120 = vmatpush1.bf16.msra.mxu0 %v528_v12  ;;  %507 = vmatpush1.bf16.msra.mxu1 %v528_v12  ;;  %p536_p0 = scmp.ne.s32.totalorder %s443_s7, %s535_s8  ;;  %p541_p2 = scmp.lt.s32.totalorder %s535_s8, %s535_s8 }
   0xe   :  { %463 = vmatprep.subr.msk.bf16.mxu0 %vm108_vm0, %v462_v13  ;;  %504 = vmatprep.subr.msk.bf16.mxu1 %vm108_vm0, %v462_v13 }
   0xf   :  { %p542_p3 = por %p541_p2, %p540_p1 }
  0x11   :  { %122 = vmatpush1.bf16.msra.mxu0 %v110_v15  ;;  %508 = vmatpush1.bf16.msra.mxu1 %v110_v15  ;;  %p543_p4 = pnand %p542_p3, %p536_p0 }
  0x81   :  { %v31_v18 = vpop.permute.xlu0 %30  ;;  %v25_v19 = vpop.permute.xlu1 %24 }
  0x82   :  { %vm40_vm1 = vcmp.eq.s32.totalorder %v31_v18, %v22_v17  ;;  %vm38_vm2 = vcmp.eq.s32.totalorder %v25_v19, %v22_v17 }
  0x83   :  { %v452_v23 = vsel %vm40_vm1, 1.0, %v560_v22  ;;  %v450_v24 = vsel %vm38_vm2, 1.0, %v560_v22 }
  0x85   :  { %v34_v20 = vpop.permute.xlu0 %33  ;;  %v28_v21 = vpop.permute.xlu1 %27 }
  0x86   :  { %vm41_vm3 = vcmp.eq.s32.totalorder %v34_v20, %v22_v17  ;;  %vm39_vm4 = vcmp.eq.s32.totalorder %v28_v21, %v22_v17 }
  0x87   :  { %v453_v25 = vsel %vm41_vm3, 1.0, %v560_v22  ;;  %v451_v26 = vsel %vm39_vm4, 1.0, %v560_v22 }
  0x88   :  { %v54_v27 = vpack.c.bf16 %v453_v25, %v452_v23  ;;  %v53_v28 = vpack.c.bf16 %v451_v26, %v450_v24  ;;  %v341_v26 = vld [vmem:[%s735_s2 + $0x20] sm:$0xff] }
  0x89   :  { %v37_v29 = vpop.permute.xlu0 %36 }
  0x8a   :  { %vm42_vm6 = vcmp.eq.s32.totalorder %v37_v29, %v22_v17  ;;  %464 = vmatmul.mubr.msk.bf16.vlgmr.msra.gmra.mrb[0].mxu0 %vm98_vm5, %v53_v28  ;;  %465 = vmatmul.mubr.msk.bf16.vlgmr.msra.gmra.mrb[0].mxu1 %vm98_vm5, %v54_v27  ;;  %v342_v27 = vld [vmem:[%s735_s2 + $0x28] sm:$0xff]  ;;  %v565_v29 = vmov 0.0|0.0  }
  0x8b   :  { %167 = vmatprep.mubr.bf16.mxu1 %v559_v2  ;;  %v454_v30 = vsel %vm42_vm6, 1.0, %v560_v22  ;;  %v493_v28 = vpack.c.bf16 %v342_v27, %v341_v26  ;;  %492 = vmatprep.subr.bf16.mxu0 %v565_v29 }
  0x8c   :  { %v55_v31 = vpack.c.bf16 %v454_v30, %v454_v30  ;;  %v343_v30 = vld [vmem:[%s735_s2 + $0x30] sm:$0xff]  ;;  %489 = vmatprep.mubr.msk.f32.mxu0 %vm566_vm11, %v560_v22 }
  0x8d   :  { %494 = vmatpush3.bf16.msra.mxu0 %v493_v28 }
  0x8e   :  { %495 = vmatprep.subr.bf16.mxu0 %v565_v29 }
  0x92   :  { %466 = vmatmul.mubr.msk.bf16.gmra.mrb[4].mxu1 %vm98_vm5, %v55_v31  ;;  %v344_v31 = vld [vmem:[%s735_s2 + $0x38] sm:$0xff] }
 0x15d   :  { %v634_v32 = vpop.f32.mrb[0].mxu0  ;;  %v636_v33 = vpop.f32.mrb[0].mxu1 }
 0x15e   :  { %v182_v34 = vrot.slane %v634_v32, 1  ;;  %v213_v35 = vrot.slane %v634_v32, 2  ;;  %v185_v36 = vrot.slane %v636_v33, 1  ;;  %v151_v37 = vpop.f32.mrb[1].mxu0  ;;  %v161_v38 = vpop.f32.mrb[1].mxu1  ;;  %v219_v39 = vrot.slane %v636_v33, 2 }
 0x15f   :  { %v216_v40 = vrot.slane %v151_v37, 2  ;;  %v261_v41 = vrot.slane %v151_v37, 3  ;;  %v287_v42 = vrot.slane %v151_v37, 4  ;;  %v642_v43 = vpop.f32.mrb[2].mxu0  ;;  %v644_v44 = vpop.f32.mrb[2].mxu1  ;;  %v221_v45 = vrot.slane %v161_v38, 2 }
 0x160   :  { %v264_v46 = vrot.slane %v161_v38, 3  ;;  %v183_v47 = vrot.slane %v642_v43, 1  ;;  %v214_v48 = vrot.slane %v642_v43, 2  ;;  %v155_v49 = vpop.f32.mrb[3].mxu0  ;;  %v165_v50 = vpop.f32.mrb[3].mxu1  ;;  %v187_v51 = vrot.slane %v644_v44, 1 }
 0x161   :  { %v223_v52 = vrot.slane %v644_v44, 2  ;;  %v217_v53 = vrot.slane %v155_v49, 2  ;;  %v262_v54 = vrot.slane %v155_v49, 3  ;;  %v290_v55 = vrot.slane %v161_v38, 4 }
 0x162   :  { %v288_v56 = vrot.slane %v155_v49, 4  ;;  %v225_v57 = vrot.slane %v165_v50, 2  ;;  %v266_v58 = vrot.slane %v165_v50, 3  ;;  %v186_v59 = vsel %vm181_vm7, %v183_v47, %v185_v36 }
 0x163   :  { %v184_v60 = vsel %vm181_vm7, %v182_v34, %v183_v47  ;;  %v188_v61 = vsel %vm181_vm7, %v185_v36, %v187_v51  ;;  %v218_v62 = vsel %vm212_vm8, %v216_v40, %v217_v53  ;;  %v292_v63 = vrot.slane %v165_v50, 4  ;;  %193 = vrot.lane.b32.xlu0 %v186_v59, %s561_s0  ;;  %v346_v36 = vld [vmem:[%s735_s2 + $0x48] sm:$0xff] }
 0x164   :  { %191 = vrot.lane.b32.xlu1 %v184_v60, %s561_s0  ;;  %v215_v0 = vsel %vm212_vm8, %v213_v35, %v214_v48  ;;  %v222_v1 = vsel %vm212_vm8, %v217_v53, %v221_v45  ;;  %v220_v2 = vsel %vm212_vm8, %v214_v48, %v219_v39  ;;  %v226_v4 = vsel %vm212_vm8, %v221_v45, %v225_v57  ;;  %v345_v35 = vld [vmem:[%s735_s2 + $0x40] sm:$0xff] }
 0x165   :  { %v169_v3 = vpop.f32.mrb[4].mxu1  ;;  %v224_v5 = vsel %vm212_vm8, %v219_v39, %v223_v52  ;;  %v265_v6 = vsel %vm260_vm9, %v262_v54, %v264_v46  ;;  %v263_v7 = vsel %vm260_vm9, %v261_v41, %v262_v54  ;;  %v267_v11 = vsel %vm260_vm9, %v264_v46, %v266_v58 }
 0x166   :  { %v189_v8 = vrot.slane %v169_v3, 1  ;;  %v227_v9 = vrot.slane %v169_v3, 2  ;;  %v171_v10 = vpop.f32.mrb[5].mxu1  ;;  %v291_v12 = vsel %vm286_vm10, %v288_v56, %v290_v55  ;;  %v289_v17 = vsel %vm286_vm10, %v287_v42, %v288_v56 }
 0x167   :  { %v229_v13 = vrot.slane %v171_v10, 2  ;;  %v268_v14 = vrot.slane %v171_v10, 3  ;;  %v294_v15 = vrot.slane %v171_v10, 4  ;;  %v173_v16 = vpop.f32.mrb[6].mxu1  ;;  %233 = vrot.lane.b32.xlu0 %v218_v62, %s562_s1  ;;  %v293_v21 = vsel %vm286_vm10, %v290_v55, %v292_v63 }
 0x168   :  { %195 = vrot.lane.b32.xlu1 %v188_v61, %s561_s0  ;;  %v174_v18 = vpop.f32.mrb[7].mxu1  ;;  %v190_v19 = vsel %vm181_vm7, %v187_v51, %v189_v8  ;;  %v228_v20 = vsel %vm212_vm8, %v223_v52, %v227_v9  ;;  %v496_v34 = vpack.c.bf16 %v344_v31, %v343_v30  ;;  %v499_v37 = vpack.c.bf16 %v346_v36, %v345_v35 }
 0x169   :  { %v230_v23 = vsel %vm212_vm8, %v225_v57, %v229_v13  ;;  %v269_v24 = vsel %vm260_vm9, %v266_v58, %v268_v14  ;;  %v295_v25 = vsel %vm286_vm10, %v292_v63, %v294_v15  ;;  %v315_v13 = vld [vmem:[%s735_s2 + $0x18] sm:$0xff] }
 0x16a   :  { %497 = vmatpush3.bf16.msra.mxu0 %v496_v34 }
 0x16b   :  { %237 = vrot.lane.b32.xlu0 %v222_v1, %s562_s1  ;;  %498 = vmatprep.subr.bf16.mxu0 %v565_v29 }
 0x16c   :  { %231 = vrot.lane.b32.xlu1 %v215_v0, %s562_s1 }
 0x16e   :  { %500 = vmatpush3.bf16.msra.mxu0 %v499_v37 }
 0x16f   :  { %241 = vrot.lane.b32.xlu0 %v226_v4, %s562_s1 }
 0x170   :  { %235 = vrot.lane.b32.xlu1 %v220_v2, %s562_s1 }
 0x173   :  { %272 = vrot.lane.b32.xlu0 %v265_v6, %s563_s9 }
 0x174   :  { %239 = vrot.lane.b32.xlu1 %v224_v5, %s562_s1 }
 0x177   :  { %197 = vrot.lane.b32.xlu0 %v190_v19, %s561_s0 }
 0x178   :  { %270 = vrot.lane.b32.xlu1 %v263_v7, %s563_s9 }
 0x17b   :  { %298 = vrot.lane.b32.xlu0 %v291_v12, %s564_s10  ;;  %v314_v12 = vld [vmem:[%s735_s2 + $0x10] sm:$0xff] }
 0x17c   :  { %274 = vrot.lane.b32.xlu1 %v267_v11, %s563_s9 }
 0x17f   :  { %245 = vrot.lane.b32.xlu0 %v230_v23, %s562_s1 }
 0x180   :  { %243 = vrot.lane.b32.xlu1 %v228_v20, %s562_s1 }
 0x183   :  { %276 = vrot.lane.b32.xlu0 %v269_v24, %s563_s9 }
 0x184   :  { %296 = vrot.lane.b32.xlu1 %v289_v17, %s564_s10 }
 0x187   :  { %302 = vrot.lane.b32.xlu0 %v295_v25, %s564_s10 }
 0x188   :  { %300 = vrot.lane.b32.xlu1 %v293_v21, %s564_s10 }
 0x1d5   :  { %v194_v38 = vpop.permute.xlu0 %193 }
 0x1d6   :  { %v192_v39 = vpop.permute.xlu1 %191  ;;  %v204_v22 = vadd.f32 %v194_v38, %v642_v43  ;;  %v313_v43 = vld [vmem:[%s735_s2 + $0x8] sm:$0xff] }
 0x1d7   :  { %v203_v57 = vadd.f32 %v192_v39, %v634_v32  ;;  %v312_v32 = vld [vmem:[%s735_s2] sm:$0xff] }
 0x1d9   :  { %v234_v41 = vpop.permute.xlu0 %233 }
 0x1da   :  { %v196_v40 = vpop.permute.xlu1 %195 }
 0x1db   :  { %v205_v2 = vadd.f32 %v196_v40, %v636_v33 }
 0x1dd   :  { %v238_v45 = vpop.permute.xlu0 %237 }
 0x1de   :  { %v232_v42 = vpop.permute.xlu1 %231 }
 0x1df   :  { %v248_v56 = vsel %vm247_vm12, %v232_v42, %v234_v41 }
 0x1e0   :  { %v256_v61 = vadd.f32 %v248_v56, %v203_v57 }
 0x1e1   :  { %v242_v47 = vpop.permute.xlu0 %241 }
 0x1e2   :  { %v236_v46 = vpop.permute.xlu1 %235 }
 0x1e3   :  { %v249_v50 = vsel %vm247_vm12, %v236_v46, %v238_v45  ;;  %v467_v45 = vld [vmem:[%s735_s2 + $0x50] ss:$0 sm:$0xff] }
 0x1e4   :  { %v257_v53 = vadd.f32 %v249_v50, %v204_v22 }
 0x1e5   :  { %v273_v49 = vpop.permute.xlu0 %272 }
 0x1e6   :  { %v240_v48 = vpop.permute.xlu1 %239  ;;  %v283_v58 = vadd.f32 %v273_v49, %v257_v53 }
 0x1e7   :  { %v250_v1 = vsel %vm247_vm12, %v240_v48, %v242_v47 }
 0x1e9   :  { %v198_v52 = vpop.permute.xlu0 %197 }
 0x1ea   :  { %v271_v51 = vpop.permute.xlu1 %270  ;;  %v206_v62 = vadd.f32 %v198_v52, %v644_v44  ;;  %v258_v44 = vadd.f32 %v250_v1, %v205_v2 }
 0x1eb   :  { %v282_v3 = vadd.f32 %v271_v51, %v256_v61 }
 0x1ed   :  { %v299_v55 = vpop.permute.xlu0 %298 }
 0x1ee   :  { %v275_v54 = vpop.permute.xlu1 %274  ;;  %v309_v63 = vadd.f32 %v299_v55, %v283_v58 }
 0x1ef   :  { %v284_v9 = vadd.f32 %v275_v54, %v258_v44 }
 0x1f0   :  { %v317_v7 = vadd.f32 %v313_v43, %v309_v63 }
 0x1f1   :  { %v246_v60 = vpop.permute.xlu0 %245 }
 0x1f2   :  { %v244_v59 = vpop.permute.xlu1 %243  ;;  %v322_v15 = vsel %vm320_vm13, %v317_v7, -inf }
 0x1f3   :  { %v251_v0 = vsel %vm247_vm12, %v244_v59, %v246_v60 }
 0x1f4   :  { %v259_v4 = vadd.f32 %v251_v0, %v206_v62 }
 0x1f5   :  { %v277_v6 = vpop.permute.xlu0 %276 }
 0x1f6   :  { %v297_v5 = vpop.permute.xlu1 %296  ;;  %v285_v11 = vadd.f32 %v277_v6, %v259_v4 }
 0x1f7   :  { %v308_v8 = vadd.f32 %v297_v5, %v282_v3 }
 0x1f9   :  { %v316_v10 = vadd.f32 %v312_v32, %v308_v8  ;;  %v303_v14 = vpop.permute.xlu0 %302 }
 0x1fa   :  { %v301_v33 = vpop.permute.xlu1 %300  ;;  %v311_v18 = vadd.f32 %v303_v14, %v285_v11 }
 0x1fb   :  { %v321_v16 = vsel %vm320_vm13, %v316_v10, -inf  ;;  %v310_v17 = vadd.f32 %v301_v33, %v284_v9 }
 0x1fc   :  { %v323_v19 = vmax.f32 %v321_v16, %v322_v15  ;;  %v319_v21 = vadd.f32 %v315_v13, %v311_v18 }
 0x1fd   :  { %v318_v20 = vadd.f32 %v314_v12, %v310_v17 }
 0x1fe   :  { %v324_v23 = vrot.slane %v323_v19, 4  ;;  %v331_v25 = vsel %vm320_vm13, %v319_v21, -inf }
 0x1ff   :  { %v330_v24 = vsel %vm320_vm13, %v318_v20, -inf }
 0x200   :  { %v325_v26 = vmax.f32 %v323_v19, %v324_v23  ;;  %v332_v27 = vmax.f32 %v330_v24, %v331_v25 }
 0x202   :  { %v326_v28 = vrot.slane %v325_v26, 2  ;;  %v333_v29 = vrot.slane %v332_v27, 4 }
 0x204   :  { %v327_v30 = vmax.f32 %v325_v26, %v326_v28  ;;  %v334_v31 = vmax.f32 %v332_v27, %v333_v29 }
 0x206   :  { %v328_v34 = vrot.slane %v327_v30, 1  ;;  %v335_v35 = vrot.slane %v334_v31, 2 }
 0x208   :  { %v336_v36 = vmax.f32 %v334_v31, %v335_v35  ;;  %v329_v38 = vmax.f32 %v327_v30, %v328_v34 }
 0x20a   :  { %v337_v37 = vrot.slane %v336_v36, 1  ;;  %v339_v40 = vmax.f32 %v329_v38, 0.0 }
 0x20c   :  { %v338_v39 = vmax.f32 %v336_v36, %v337_v37 }
 0x20e   :  { %v340_v41 = vmax.f32 %v338_v39, 0.0 }
 0x210   :  { %v355_v42 = vsel %vm354_vm14, %v340_v41, %v339_v40 }
 0x211   :  { %490 = vmatmul.mubr.msk.f32.vlgmr.msra.gmra.mrb[4].mxu0 %vm320_vm13, %v355_v42 }
 0x2e4   :  { %v424_v46 = vpop.f32.mrb[4].mxu0 }
 0x2e5   :  { %v425_v47 = vadd.f32 %v467_v45, %v424_v46  ;;  %v491_v48 = vpop.f32.mrb[5].mxu0 }
 0x2e7   :  { %v469_v49 = vmul.f32 -1.442695, %v425_v47 }
 0x2e9   :  { %531 = vpow2.f32 %v469_v49 }
 0x2f3   :  { %v532_v50 = vpop.eup %531 }
 0x2f4   :  { %v431_v51 = vadd.f32 1.0, %v532_v50 }
 0x2f6   :  { %533 = vrcp.f32 %v431_v51 }
 0x300   :  { %v534_v52 = vpop.eup %533 }
 0x301   :  { %435 = vst.msk [vmem:[#allocation2] sm:$0x3] %vm434_vm15, %v534_v52 }
 0x302   :  { %546 = shalt.err (!%p543_p4)
}
 0x303   :  { %s547_s1 = scalar_lea.hbm %s736_s3, 32 }
 0x304   :  { %p548_p5 = scmp.ne.s32.totalorder %s736_s3, %s547_s1  ;;  %p551_p6 = scmp.lt.u32.totalorder %s547_s1, %s736_s3 }
 0x306   :  { %p553_p7 = pnand %p551_p6, %p548_p5 }
 0x308   :  { %556 = shalt.err (!%p553_p7)
}
 0x309   :  { %445 = dma.vmem_to_hbm [thread:$0]  %s443_s7, 32, %s736_s3, [#allocation3]  }
 0x30a   :  { %557 = dma.done.wait [#allocation3], 32  }
 0x30b   :  { %558 = vsyncadd [#allocation3], 4294967264 }
 0x30c   :  { %449 = vsyncpa [#allocation3], 1 }

</bundles_post_ra>
